<compile_context>
chip_gen: v5e
topology: v5e:2x2
jax: 0.10.0
libtpu: 0.0.40
codegen_flags: <defaults>
</compile_context>

<pallas_src>
import functools
import math

import jax
import jax.numpy as jnp
from jax.experimental import pallas as pl
from jax.experimental.pallas import tpu as pltpu


def _layer_norm(h, gamma, beta, eps=1e-5):
    # h, gamma, beta in f32; matches torch.nn.LayerNorm (eps=1e-5).
    mu = jnp.mean(h, axis=-1, keepdims=True)
    var = jnp.mean((h - mu) ** 2, axis=-1, keepdims=True)
    return (h - mu) * jax.lax.rsqrt(var + eps) * gamma + beta


def encoder_layer_kernel(n_head, exp_dtype,
                         x_ref, wqkv_ref, bqkv_ref,
                         w1_ref, b1_ref, w2_ref, b2_ref,
                         g1_ref, bt1_ref, g2_ref, bt2_ref,
                         o_ref):
    x = x_ref[...]                                  # (N, D), native dtype
    N, D = x.shape
    dh = D // n_head
    in_dtype = x.dtype

    # ---- fused QKV projection: one wide MXU pass against (D, 3D) ----
    qkv = (jnp.dot(x, wqkv_ref[...], preferred_element_type=jnp.float32)
           + bqkv_ref[...].astype(jnp.float32)).astype(in_dtype)

    def split_heads(t):                             # (N, D) -> (n_head, N, dh)
        return pltpu.einshape("nhd->hnd", t.reshape(N, n_head, dh))

    q3 = split_heads(qkv[:, 0 * D:1 * D])   # 1/sqrt(dh) folded into wq/bq (wrapper)
    k3 = split_heads(qkv[:, 1 * D:2 * D])
    v3 = split_heads(qkv[:, 2 * D:3 * D])

    # ---- batched multi-head self-attention (mask=None branch) ----
    # One batched dot_general over the head axis (NT form, no kh.T
    # materialized), instead of a per-head Python unroll.
    s = jnp.einsum("hqd,hkd->hqk", q3, k3,
                   preferred_element_type=jnp.float32)       # (H, N, N) f32
    s = s - jnp.max(s, axis=-1, keepdims=True)
    # exp in bf16 on bf16 inputs (bf16 EUP on v6e/v7x); denominator in f32.
    p = jnp.exp(s.astype(exp_dtype))
    denom = jnp.sum(p, axis=-1, keepdims=True, dtype=jnp.float32)  # (H, N, 1)
    r = pl.reciprocal(denom, approx=True)
    r = r * (2.0 - denom * r)          # one Newton step, off the EUP crit path
    # Normalize AFTER P.V: scales (H, N, dh) elements instead of (H, N, N).
    o3 = jnp.einsum("hqk,hkd->hqd", p.astype(in_dtype), v3,
                    preferred_element_type=jnp.float32)      # (H, N, dh) f32
    o3 = o3 * r
    attn_out = pltpu.einshape("hnd->nhd", o3).reshape(N, D)  # (N, D) f32

    # dropout1 -> identity
    x32 = x.astype(jnp.float32)
    h32 = _layer_norm(x32 + attn_out,
                      g1_ref[...].astype(jnp.float32),
                      bt1_ref[...].astype(jnp.float32))

    # ---- feed-forward ----
    h = h32.astype(in_dtype)
    f = (jnp.dot(h, w1_ref[...], preferred_element_type=jnp.float32)
         + b1_ref[...].astype(jnp.float32))
    f = jnp.maximum(f, 0.0).astype(in_dtype)
    f = (jnp.dot(f, w2_ref[...], preferred_element_type=jnp.float32)
         + b2_ref[...].astype(jnp.float32))

    # dropout2 -> identity
    y = _layer_norm(h32 + f,
                    g2_ref[...].astype(jnp.float32),
                    bt2_ref[...].astype(jnp.float32))
    o_ref[...] = y.astype(o_ref.dtype)


def _vmem_budget_bytes(N, D, H, n_head, itemsize):
    """VMEM budget computed from actual buffer sizes (generation-aware)."""
    f32 = 4
    io = 2 * 2 * N * D * itemsize                         # x + out, double-buffered
    weights = (3 * D * D + 3 * D + 2 * D * H + H + 5 * D) * itemsize  # single copy
    live = f32 * (3 * N * D                               # fused qkv accumulator
                  + 3 * N * D                             # head-major q/k/v
                  + 2 * n_head * N * N                    # scores + exp(scores)
                  + 3 * N * D                             # attn out, h32, residual
                  + N * H)                                # FFN hidden
    budget = int(1.5 * (io + weights + live)) + (4 << 20)  # headroom + Mosaic scratch
    # >= 16 MiB floor; <= 112 MiB cap (v5e/v6e have 128 MiB; sequences that
    # need more than ~56 MiB on v7x's 64 MiB/TC require the row/KV tiling TODO).
    return max(16 << 20, min(budget, 112 << 20))


def encoder_layer(x, params, n_head, *, vmem_limit_bytes=None):
    B, N, D = x.shape
    H = params["w1"].shape[1]
    assert D % n_head == 0

    dtype = x.dtype
    # Fuse the three projection weights into one (D, 3D) operand and fold the
    # attention scale (1/sqrt(d_head)) directly into the query weights/bias.
    inv_scale = 1.0 / math.sqrt(D // n_head)
    wqkv = jnp.concatenate(
        [params["wq"] * inv_scale, params["wk"], params["wv"]], axis=1).astype(dtype)
    bqkv = jnp.concatenate(
        [params["bq"] * inv_scale, params["bk"], params["bv"]], axis=1).astype(dtype)

    def cast(name):
        return params[name].astype(dtype)

    operands = (x, wqkv, bqkv,
                cast("w1"), cast("b1"), cast("w2"), cast("b2"),
                cast("g1"), cast("bt1"), cast("g2"), cast("bt2"))

    # bf16 softmax-exp only pays off where the EUP is bf16 (v6e/v7x); on v5e
    # keep f32 operands (no bf16 VPU/EUP there), which keeps this path f32.
    exp_dtype = jnp.bfloat16 if dtype == jnp.bfloat16 else jnp.float32

    if vmem_limit_bytes is None:
        vmem_limit_bytes = _vmem_budget_bytes(N, D, H, n_head,
                                              jnp.dtype(dtype).itemsize)

    # Weights/biases: whole-array VMEM residents -> single copy for the entire
    # grid, no per-step refetch and no double-buffering (v7x VMEM budget).
    w_spec = pl.BlockSpec(memory_space=pltpu.MemorySpace.VMEM)

    in_specs = [pl.BlockSpec((None, N, D), lambda b: (b, 0, 0))] + [w_spec] * 10

    return pl.pallas_call(
        functools.partial(encoder_layer_kernel, n_head, exp_dtype),
        out_shape=jax.ShapeDtypeStruct((B, N, D), x.dtype),
        grid_spec=pltpu.PrefetchScalarGridSpec(
            num_scalar_prefetch=0,
            grid=(B,),
            in_specs=in_specs,
            out_specs=pl.BlockSpec((None, N, D), lambda b: (b, 0, 0)),
        ),
        compiler_params=pltpu.CompilerParams(
            dimension_semantics=("parallel",),
            vmem_limit_bytes=vmem_limit_bytes,
        ),
    )(*operands)


def _reference(x, p, n_head):
    """Pure-JAX reference mirroring the PyTorch forward (dropout = identity).

    Matmuls run at HIGHEST precision so the reference itself is true f32.
    """
    B, N, D = x.shape
    dh = D // n_head
    hi = jax.lax.Precision.HIGHEST

    def ln(h, g, b, eps=1e-5):
        mu = jnp.mean(h, -1, keepdims=True)
        var = jnp.mean((h - mu) ** 2, -1, keepdims=True)
        return (h - mu) / jnp.sqrt(var + eps) * g + b

    def proj(w, b_):
        return jnp.einsum("bnd,de->bne", x, w, precision=hi) + b_

    q = proj(p["wq"], p["bq"]).reshape(B, N, n_head, dh).transpose(0, 2, 1, 3)
    k = proj(p["wk"], p["bk"]).reshape(B, N, n_head, dh).transpose(0, 2, 1, 3)
    v = proj(p["wv"], p["bv"]).reshape(B, N, n_head, dh).transpose(0, 2, 1, 3)
    attn = jnp.einsum("bhnd,bhmd->bhnm", q, k, precision=hi) / jnp.sqrt(jnp.float32(dh))
    attn = jax.nn.softmax(attn, axis=-1)
    out = jnp.einsum("bhnm,bhmd->bhnd", attn, v, precision=hi)
    out = out.transpose(0, 2, 1, 3).reshape(B, N, D)
    h = ln(x + out, p["g1"], p["bt1"])
    f = jnp.einsum("bnd,df->bnf", h, p["w1"], precision=hi) + p["b1"]
    f = jnp.einsum("bnf,fd->bnd", jnp.maximum(f, 0.0), p["w2"], precision=hi) + p["b2"]
    return ln(h + f, p["g2"], p["bt2"])


if __name__ == "__main__":
    B, N, D = 2, 8, 32          # batch, seq_len, d_model
    n_head = 4
    ff_hidnum = 64

    key = jax.random.PRNGKey(0)
    ks = jax.random.split(key, 12)

    def w(k, shape, scale=0.05):
        return (scale * jax.random.normal(k, shape)).astype(jnp.float32)

    params = {
        "wq": w(ks[0], (D, D)), "bq": w(ks[1], (1, D)),
        "wk": w(ks[2], (D, D)), "bk": w(ks[3], (1, D)),
        "wv": w(ks[4], (D, D)), "bv": w(ks[5], (1, D)),
        "w1": w(ks[6], (D, ff_hidnum)), "b1": w(ks[7], (1, ff_hidnum)),
        "w2": w(ks[8], (ff_hidnum, D)), "b2": w(ks[9], (1, D)),
        # LayerNorm affine params (PyTorch default init: ones / zeros)
        "g1": jnp.ones((1, D), jnp.float32), "bt1": jnp.zeros((1, D), jnp.float32),
        "g2": jnp.ones((1, D), jnp.float32), "bt2": jnp.zeros((1, D), jnp.float32),
    }

    x = jax.random.normal(ks[10], (B, N, D), dtype=jnp.float32)

    y_ref = _reference(x, params, n_head)

    # ---- f32 operands: tight numerical check ----
    y = jax.block_until_ready(encoder_layer(x, params, n_head))
    assert y.shape == (B, N, D)
    # Remaining slack covers possible reduced-precision MXU passes for f32
    # operands; the approx reciprocal is Newton-refined so it contributes ~0.
    assert jnp.allclose(y, y_ref, atol=5e-3, rtol=5e-3), "f32 mismatch vs reference"

    # ---- bf16 operands (recommended on v6e/v7x): smoke + loose check ----
    params_bf16 = {k_: v.astype(jnp.bfloat16) for k_, v in params.items()}
    y16 = jax.block_until_ready(
        encoder_layer(x.astype(jnp.bfloat16), params_bf16, n_head))
    y16 = y16.astype(jnp.float32)
    assert y16.shape == (B, N, D)
    assert bool(jnp.all(jnp.isfinite(y16)))
    assert jnp.allclose(y16, y_ref, atol=1e-1, rtol=1e-1), "bf16 mismatch vs reference"

    print("KERNEL_OK")
</pallas_src>

<mosaic_0001>
module attributes {stable_mosaic.version = 11 : i64} {
  func.func @encoder_layer_kernel(%arg0: i32, %arg1: memref<1x8x32xf32, #tpu.memory_space<vmem>>, %arg2: memref<32x96xf32, #tpu.memory_space<vmem>>, %arg3: memref<1x96xf32, #tpu.memory_space<vmem>>, %arg4: memref<32x64xf32, #tpu.memory_space<vmem>>, %arg5: memref<1x64xf32, #tpu.memory_space<vmem>>, %arg6: memref<64x32xf32, #tpu.memory_space<vmem>>, %arg7: memref<1x32xf32, #tpu.memory_space<vmem>>, %arg8: memref<1x32xf32, #tpu.memory_space<vmem>>, %arg9: memref<1x32xf32, #tpu.memory_space<vmem>>, %arg10: memref<1x32xf32, #tpu.memory_space<vmem>>, %arg11: memref<1x32xf32, #tpu.memory_space<vmem>>, %arg12: memref<1x8x32xf32, #tpu.memory_space<vmem>>) attributes {dimension_semantics = [#tpu.dimension_semantics<parallel>], iteration_bounds = array<i64: 2>, scalar_prefetch = 0 : i64, scratch_operands = 0 : i64, tpu.core_type = #tpu.core_type<tc>, window_params = [{transform_indices = @transform_0, window_bounds = array<i64: 1, 8, 32>}, {pipeline_mode = #tpu.pipeline_mode<synchronous>, transform_indices = @transform_1, window_bounds = array<i64: 32, 96>}, {pipeline_mode = #tpu.pipeline_mode<synchronous>, transform_indices = @transform_2, window_bounds = array<i64: 1, 96>}, {pipeline_mode = #tpu.pipeline_mode<synchronous>, transform_indices = @transform_3, window_bounds = array<i64: 32, 64>}, {pipeline_mode = #tpu.pipeline_mode<synchronous>, transform_indices = @transform_4, window_bounds = array<i64: 1, 64>}, {pipeline_mode = #tpu.pipeline_mode<synchronous>, transform_indices = @transform_5, window_bounds = array<i64: 64, 32>}, {pipeline_mode = #tpu.pipeline_mode<synchronous>, transform_indices = @transform_6, window_bounds = array<i64: 1, 32>}, {pipeline_mode = #tpu.pipeline_mode<synchronous>, transform_indices = @transform_7, window_bounds = array<i64: 1, 32>}, {pipeline_mode = #tpu.pipeline_mode<synchronous>, transform_indices = @transform_8, window_bounds = array<i64: 1, 32>}, {pipeline_mode = #tpu.pipeline_mode<synchronous>, transform_indices = @transform_9, window_bounds = array<i64: 1, 32>}, {pipeline_mode = #tpu.pipeline_mode<synchronous>, transform_indices = @transform_10, window_bounds = array<i64: 1, 32>}, {transform_indices = @transform_11, window_bounds = array<i64: 1, 8, 32>}]} {
    %c0 = arith.constant 0 : index
    %c0_0 = arith.constant 0 : index
    %c0_1 = arith.constant 0 : index
    %0 = vector.load %arg1[%c0, %c0_0, %c0_1] : memref<1x8x32xf32, #tpu.memory_space<vmem>>, vector<1x8x32xf32>
    %1 = vector.shape_cast %0 : vector<1x8x32xf32> to vector<8x32xf32>
    %c0_2 = arith.constant 0 : index
    %c0_3 = arith.constant 0 : index
    %2 = vector.load %arg2[%c0_2, %c0_3] : memref<32x96xf32, #tpu.memory_space<vmem>>, vector<32x96xf32>
    %cst = arith.constant dense<0.000000e+00> : vector<8x96xf32>
    %3 = tpu.matmul %1, %2, %cst {dimension_numbers = #tpu.dot_dimension_numbers<[1], [0], [0], [1], [0, 0, 1, 1], [], []>} : vector<8x32xf32>, vector<32x96xf32>, vector<8x96xf32> -> vector<8x96xf32>
    %c0_4 = arith.constant 0 : index
    %c0_5 = arith.constant 0 : index
    %4 = vector.load %arg3[%c0_4, %c0_5] : memref<1x96xf32, #tpu.memory_space<vmem>>, vector<1x96xf32>
    %5 = vector.broadcast %4 : vector<1x96xf32> to vector<8x96xf32>
    %6 = arith.addf %3, %5 : vector<8x96xf32>
    %7 = vector.extract_strided_slice %6 {offsets = [0, 0], sizes = [8, 32], strides = [1, 1]} : vector<8x96xf32> to vector<8x32xf32>
    %8 = vector.shape_cast %7 : vector<8x32xf32> to vector<8x4x8xf32>
    %9 = tpu.transpose %8, [1, 0, 2] : vector<8x4x8xf32> -> vector<4x8x8xf32>
    %10 = vector.extract_strided_slice %6 {offsets = [0, 32], sizes = [8, 32], strides = [1, 1]} : vector<8x96xf32> to vector<8x32xf32>
    %11 = vector.shape_cast %10 : vector<8x32xf32> to vector<8x4x8xf32>
    %12 = tpu.transpose %11, [1, 0, 2] : vector<8x4x8xf32> -> vector<4x8x8xf32>
    %13 = vector.extract_strided_slice %6 {offsets = [0, 64], sizes = [8, 32], strides = [1, 1]} : vector<8x96xf32> to vector<8x32xf32>
    %14 = vector.shape_cast %13 : vector<8x32xf32> to vector<8x4x8xf32>
    %15 = tpu.transpose %14, [1, 0, 2] : vector<8x4x8xf32> -> vector<4x8x8xf32>
    "tpu.trace_start"() <{level = 10 : i32, message = "hqd,hkd->hqk"}> : () -> ()
    %cst_6 = arith.constant dense<0.000000e+00> : vector<4x8x8xf32>
    %16 = tpu.matmul %9, %12, %cst_6 {dimension_numbers = #tpu.dot_dimension_numbers<[2], [2], [1], [1], [0, 0, 0, 1, 1, 1], [0], [0]>} : vector<4x8x8xf32>, vector<4x8x8xf32>, vector<4x8x8xf32> -> vector<4x8x8xf32>
    "tpu.trace_stop"() : () -> ()
    %cst_7 = arith.constant dense<0xFF800000> : vector<4x8xf32>
    %17 = vector.multi_reduction <maximumf>, %16, %cst_7 [2] : vector<4x8x8xf32> to vector<4x8xf32>
    %18 = vector.shape_cast %17 : vector<4x8xf32> to vector<4x8x1xf32>
    %19 = vector.broadcast %18 : vector<4x8x1xf32> to vector<4x8x8xf32>
    %20 = arith.subf %16, %19 : vector<4x8x8xf32>
    %21 = math.exp %20 : vector<4x8x8xf32>
    %cst_8 = arith.constant dense<0.000000e+00> : vector<4x8xf32>
    %22 = vector.multi_reduction <add>, %21, %cst_8 [2] : vector<4x8x8xf32> to vector<4x8xf32>
    %23 = vector.shape_cast %22 : vector<4x8xf32> to vector<4x8x1xf32>
    %24 = tpu.reciprocal %23 {approx = true} : vector<4x8x1xf32> -> vector<4x8x1xf32>
    %25 = arith.mulf %23, %24 : vector<4x8x1xf32>
    %cst_9 = arith.constant 2.000000e+00 : f32
    %26 = vector.broadcast %cst_9 : f32 to vector<4x8x1xf32>
    %27 = arith.subf %26, %25 : vector<4x8x1xf32>
    %28 = arith.mulf %24, %27 : vector<4x8x1xf32>
    "tpu.trace_start"() <{level = 10 : i32, message = "hqk,hkd->hqd"}> : () -> ()
    %cst_10 = arith.constant dense<0.000000e+00> : vector<4x8x8xf32>
    %29 = tpu.matmul %21, %15, %cst_10 {dimension_numbers = #tpu.dot_dimension_numbers<[2], [1], [1], [2], [0, 0, 0, 1, 1, 2], [0], [0]>} : vector<4x8x8xf32>, vector<4x8x8xf32>, vector<4x8x8xf32> -> vector<4x8x8xf32>
    "tpu.trace_stop"() : () -> ()
    %30 = vector.broadcast %28 : vector<4x8x1xf32> to vector<4x8x8xf32>
    %31 = arith.mulf %29, %30 : vector<4x8x8xf32>
    %32 = tpu.transpose %31, [1, 0, 2] : vector<4x8x8xf32> -> vector<8x4x8xf32>
    %33 = vector.shape_cast %32 : vector<8x4x8xf32> to vector<8x32xf32>
    %34 = arith.addf %1, %33 : vector<8x32xf32>
    %c0_11 = arith.constant 0 : index
    %c0_12 = arith.constant 0 : index
    %35 = vector.load %arg8[%c0_11, %c0_12] : memref<1x32xf32, #tpu.memory_space<vmem>>, vector<1x32xf32>
    %c0_13 = arith.constant 0 : index
    %c0_14 = arith.constant 0 : index
    %36 = vector.load %arg9[%c0_13, %c0_14] : memref<1x32xf32, #tpu.memory_space<vmem>>, vector<1x32xf32>
    %cst_15 = arith.constant dense<0.000000e+00> : vector<8xf32>
    %37 = vector.multi_reduction <add>, %34, %cst_15 [1] : vector<8x32xf32> to vector<8xf32>
    %38 = vector.shape_cast %37 : vector<8xf32> to vector<8x1xf32>
    %cst_16 = arith.constant 3.200000e+01 : f32
    %39 = vector.broadcast %cst_16 : f32 to vector<8x1xf32>
    %40 = arith.divf %38, %39 : vector<8x1xf32>
    %41 = vector.broadcast %40 : vector<8x1xf32> to vector<8x32xf32>
    %42 = arith.subf %34, %41 : vector<8x32xf32>
    %43 = arith.mulf %42, %42 : vector<8x32xf32>
    %cst_17 = arith.constant dense<0.000000e+00> : vector<8xf32>
    %44 = vector.multi_reduction <add>, %43, %cst_17 [1] : vector<8x32xf32> to vector<8xf32>
    %45 = vector.shape_cast %44 : vector<8xf32> to vector<8x1xf32>
    %cst_18 = arith.constant 3.200000e+01 : f32
    %46 = vector.broadcast %cst_18 : f32 to vector<8x1xf32>
    %47 = arith.divf %45, %46 : vector<8x1xf32>
    %48 = vector.broadcast %40 : vector<8x1xf32> to vector<8x32xf32>
    %49 = arith.subf %34, %48 : vector<8x32xf32>
    %cst_19 = arith.constant 9.99999974E-6 : f32
    %50 = vector.broadcast %cst_19 : f32 to vector<8x1xf32>
    %51 = arith.addf %47, %50 : vector<8x1xf32>
    %52 = math.rsqrt %51 : vector<8x1xf32>
    %53 = vector.broadcast %52 : vector<8x1xf32> to vector<8x32xf32>
    %54 = arith.mulf %49, %53 : vector<8x32xf32>
    %55 = vector.broadcast %35 : vector<1x32xf32> to vector<8x32xf32>
    %56 = arith.mulf %54, %55 : vector<8x32xf32>
    %57 = vector.broadcast %36 : vector<1x32xf32> to vector<8x32xf32>
    %58 = arith.addf %56, %57 : vector<8x32xf32>
    %c0_20 = arith.constant 0 : index
    %c0_21 = arith.constant 0 : index
    %59 = vector.load %arg4[%c0_20, %c0_21] : memref<32x64xf32, #tpu.memory_space<vmem>>, vector<32x64xf32>
    %cst_22 = arith.constant dense<0.000000e+00> : vector<8x64xf32>
    %60 = tpu.matmul %58, %59, %cst_22 {dimension_numbers = #tpu.dot_dimension_numbers<[1], [0], [0], [1], [0, 0, 1, 1], [], []>} : vector<8x32xf32>, vector<32x64xf32>, vector<8x64xf32> -> vector<8x64xf32>
    %c0_23 = arith.constant 0 : index
    %c0_24 = arith.constant 0 : index
    %61 = vector.load %arg5[%c0_23, %c0_24] : memref<1x64xf32, #tpu.memory_space<vmem>>, vector<1x64xf32>
    %62 = vector.broadcast %61 : vector<1x64xf32> to vector<8x64xf32>
    %63 = arith.addf %60, %62 : vector<8x64xf32>
    %cst_25 = arith.constant 0.000000e+00 : f32
    %64 = vector.broadcast %cst_25 : f32 to vector<8x64xf32>
    %65 = arith.maximumf %63, %64 : vector<8x64xf32>
    %c0_26 = arith.constant 0 : index
    %c0_27 = arith.constant 0 : index
    %66 = vector.load %arg6[%c0_26, %c0_27] : memref<64x32xf32, #tpu.memory_space<vmem>>, vector<64x32xf32>
    %cst_28 = arith.constant dense<0.000000e+00> : vector<8x32xf32>
    %67 = tpu.matmul %65, %66, %cst_28 {dimension_numbers = #tpu.dot_dimension_numbers<[1], [0], [0], [1], [0, 0, 1, 1], [], []>} : vector<8x64xf32>, vector<64x32xf32>, vector<8x32xf32> -> vector<8x32xf32>
    %c0_29 = arith.constant 0 : index
    %c0_30 = arith.constant 0 : index
    %68 = vector.load %arg7[%c0_29, %c0_30] : memref<1x32xf32, #tpu.memory_space<vmem>>, vector<1x32xf32>
    %69 = vector.broadcast %68 : vector<1x32xf32> to vector<8x32xf32>
    %70 = arith.addf %67, %69 : vector<8x32xf32>
    %71 = arith.addf %58, %70 : vector<8x32xf32>
    %c0_31 = arith.constant 0 : index
    %c0_32 = arith.constant 0 : index
    %72 = vector.load %arg10[%c0_31, %c0_32] : memref<1x32xf32, #tpu.memory_space<vmem>>, vector<1x32xf32>
    %c0_33 = arith.constant 0 : index
    %c0_34 = arith.constant 0 : index
    %73 = vector.load %arg11[%c0_33, %c0_34] : memref<1x32xf32, #tpu.memory_space<vmem>>, vector<1x32xf32>
    %cst_35 = arith.constant dense<0.000000e+00> : vector<8xf32>
    %74 = vector.multi_reduction <add>, %71, %cst_35 [1] : vector<8x32xf32> to vector<8xf32>
    %75 = vector.shape_cast %74 : vector<8xf32> to vector<8x1xf32>
    %cst_36 = arith.constant 3.200000e+01 : f32
    %76 = vector.broadcast %cst_36 : f32 to vector<8x1xf32>
    %77 = arith.divf %75, %76 : vector<8x1xf32>
    %78 = vector.broadcast %77 : vector<8x1xf32> to vector<8x32xf32>
    %79 = arith.subf %71, %78 : vector<8x32xf32>
    %80 = arith.mulf %79, %79 : vector<8x32xf32>
    %cst_37 = arith.constant dense<0.000000e+00> : vector<8xf32>
    %81 = vector.multi_reduction <add>, %80, %cst_37 [1] : vector<8x32xf32> to vector<8xf32>
    %82 = vector.shape_cast %81 : vector<8xf32> to vector<8x1xf32>
    %cst_38 = arith.constant 3.200000e+01 : f32
    %83 = vector.broadcast %cst_38 : f32 to vector<8x1xf32>
    %84 = arith.divf %82, %83 : vector<8x1xf32>
    %85 = vector.broadcast %77 : vector<8x1xf32> to vector<8x32xf32>
    %86 = arith.subf %71, %85 : vector<8x32xf32>
    %cst_39 = arith.constant 9.99999974E-6 : f32
    %87 = vector.broadcast %cst_39 : f32 to vector<8x1xf32>
    %88 = arith.addf %84, %87 : vector<8x1xf32>
    %89 = math.rsqrt %88 : vector<8x1xf32>
    %90 = vector.broadcast %89 : vector<8x1xf32> to vector<8x32xf32>
    %91 = arith.mulf %86, %90 : vector<8x32xf32>
    %92 = vector.broadcast %72 : vector<1x32xf32> to vector<8x32xf32>
    %93 = arith.mulf %91, %92 : vector<8x32xf32>
    %94 = vector.broadcast %73 : vector<1x32xf32> to vector<8x32xf32>
    %95 = arith.addf %93, %94 : vector<8x32xf32>
    %c0_40 = arith.constant 0 : index
    %c0_41 = arith.constant 0 : index
    %c0_42 = arith.constant 0 : index
    %96 = vector.load %arg12[%c0_40, %c0_41, %c0_42] : memref<1x8x32xf32, #tpu.memory_space<vmem>>, vector<1x8x32xf32>
    %97 = vector.shape_cast %96 : vector<1x8x32xf32> to vector<8x32xf32>
    %98 = vector.shape_cast %95 : vector<8x32xf32> to vector<1x8x32xf32>
    tpu.vector_store %arg12[%c0_40, %c0_41, %c0_42], %98 {strides = array<i32>} : memref<1x8x32xf32, #tpu.memory_space<vmem>>, vector<1x8x32xf32>,
    return
  }
  func.func @transform_0(%arg0: i32) -> (i32, i32, i32) {
    %c0_i32 = arith.constant 0 : i32
    %c0_i32_0 = arith.constant 0 : i32
    %c0_i32_1 = arith.constant 0 : i32
    return %arg0, %c0_i32, %c0_i32_0 : i32, i32, i32
  }
  func.func @transform_1(%arg0: i32) -> (i32, i32) {
    %c0_i32 = arith.constant 0 : i32
    %c0_i32_0 = arith.constant 0 : i32
    %c0_i32_1 = arith.constant 0 : i32
    return %c0_i32, %c0_i32_0 : i32, i32
  }
  func.func @transform_2(%arg0: i32) -> (i32, i32) {
    %c0_i32 = arith.constant 0 : i32
    %c0_i32_0 = arith.constant 0 : i32
    %c0_i32_1 = arith.constant 0 : i32
    return %c0_i32, %c0_i32_0 : i32, i32
  }
  func.func @transform_3(%arg0: i32) -> (i32, i32) {
    %c0_i32 = arith.constant 0 : i32
    %c0_i32_0 = arith.constant 0 : i32
    %c0_i32_1 = arith.constant 0 : i32
    return %c0_i32, %c0_i32_0 : i32, i32
  }
  func.func @transform_4(%arg0: i32) -> (i32, i32) {
    %c0_i32 = arith.constant 0 : i32
    %c0_i32_0 = arith.constant 0 : i32
    %c0_i32_1 = arith.constant 0 : i32
    return %c0_i32, %c0_i32_0 : i32, i32
  }
  func.func @transform_5(%arg0: i32) -> (i32, i32) {
    %c0_i32 = arith.constant 0 : i32
    %c0_i32_0 = arith.constant 0 : i32
    %c0_i32_1 = arith.constant 0 : i32
    return %c0_i32, %c0_i32_0 : i32, i32
  }
  func.func @transform_6(%arg0: i32) -> (i32, i32) {
    %c0_i32 = arith.constant 0 : i32
    %c0_i32_0 = arith.constant 0 : i32
    %c0_i32_1 = arith.constant 0 : i32
    return %c0_i32, %c0_i32_0 : i32, i32
  }
  func.func @transform_7(%arg0: i32) -> (i32, i32) {
    %c0_i32 = arith.constant 0 : i32
    %c0_i32_0 = arith.constant 0 : i32
    %c0_i32_1 = arith.constant 0 : i32
    return %c0_i32, %c0_i32_0 : i32, i32
  }
  func.func @transform_8(%arg0: i32) -> (i32, i32) {
    %c0_i32 = arith.constant 0 : i32
    %c0_i32_0 = arith.constant 0 : i32
    %c0_i32_1 = arith.constant 0 : i32
    return %c0_i32, %c0_i32_0 : i32, i32
  }
  func.func @transform_9(%arg0: i32) -> (i32, i32) {
    %c0_i32 = arith.constant 0 : i32
    %c0_i32_0 = arith.constant 0 : i32
    %c0_i32_1 = arith.constant 0 : i32
    return %c0_i32, %c0_i32_0 : i32, i32
  }
  func.func @transform_10(%arg0: i32) -> (i32, i32) {
    %c0_i32 = arith.constant 0 : i32
    %c0_i32_0 = arith.constant 0 : i32
    %c0_i32_1 = arith.constant 0 : i32
    return %c0_i32, %c0_i32_0 : i32, i32
  }
  func.func @transform_11(%arg0: i32) -> (i32, i32, i32) {
    %c0_i32 = arith.constant 0 : i32
    %c0_i32_0 = arith.constant 0 : i32
    %c0_i32_1 = arith.constant 0 : i32
    return %arg0, %c0_i32, %c0_i32_0 : i32, i32, i32
  }
}

</mosaic_0001>

<bundles_post_ra>
// kernel: tpu_custom_call.1
= control target key start
LH: loop header
LB: loop body
LE: loop exit
PB: predicated region body
PF: predicated region fallthrough
CT: control target
= control target key end

     0   :  { %s2004_s0 = inlined_call_operand.vmem [shape: f32[2,8,32], index: 0, kind: input, shape index: {}]   ;;  %s2005_s1 = inlined_call_operand.vmem [shape: f32[32,96], index: 1, kind: input, shape index: {}]   ;;  %s2006_s2 = inlined_call_operand.vmem [shape: f32[1,96], index: 2, kind: input, shape index: {}]   ;;  %s2007_s3 = inlined_call_operand.vmem [shape: f32[32,64], index: 3, kind: input, shape index: {}]   ;;  %s2008_s4 = inlined_call_operand.vmem [shape: f32[1,64], index: 4, kind: input, shape index: {}]   ;;  %s2009_s5 = inlined_call_operand.vmem [shape: f32[64,32], index: 5, kind: input, shape index: {}]   ;;  %s2010_s6 = inlined_call_operand.vmem [shape: f32[1,32], index: 6, kind: input, shape index: {}]   ;;  %s2011_s7 = inlined_call_operand.vmem [shape: f32[1,32], index: 7, kind: input, shape index: {}]   ;;  %s2012_s8 = inlined_call_operand.vmem [shape: f32[1,32], index: 8, kind: input, shape index: {}]   ;;  %s2013_s9 = inlined_call_operand.vmem [shape: f32[1,32], index: 9, kind: input, shape index: {}]   ;;  %s2014_s10 = inlined_call_operand.vmem [shape: f32[1,32], index: 10, kind: input, shape index: {}]   ;;  %s2015_s11 = inlined_call_operand.hbm [shape: f32[2,8,32], index: 11, kind: output, shape index: {}]  }
   0x1   :  { %2016 = sst [smem:[#allocation6_spill]] %s2004_s0 }
   0x2   :  { %16 = vsyncpa [#allocation3], 0 }
   0x3   :  { %18 = vsyncpa [#allocation3 + $0x1], 0  ;;  %s1626_s17 = smov 0   ;;  %s1628_s18 = smov 0  }
   0x4   :  { %s1630_s19 = smov 0   ;;  %s1632_s20 = smov 0  }
   0x5 LB: > { %s1647_s21 = sadd.s32 4294967295, %s1553_s20   ;;  %s1377_s22 = sadd.s32 4294967294, %s1553_s20   ;;  %s1553_s20 = sphi %s1632_s20, %s2025_s20   ;;  %s1549_s19 = sphi %s1630_s19, %s2024_s19   ;;  %s1545_s18 = sphi %s1628_s18, %s2023_s18   ;;  %s1541_s17 = sphi %s1626_s17, %s2022_s17  }
   0x6   : > { %s1651_s23 = sadd.s32 1, %s1553_s20   ;;  %s267_s24 = sadd.s32 1, %s1549_s19 }
   0x7   : > { %s264_s25 = ssub.s32 %s1553_s20, %s1651_s23  ;;  %p277_p0 = scmp.ne.s32.totalorder %s1549_s19, %s1545_s18 }
   0x8   : > { %p265_p1 = scmp.eq.s32.totalorder %s264_s25, 0  ;;  %p278_p2 = scmp.eq.s32.totalorder %s1647_s21, 1 }
   0x9   : > { %p283_p3 = scmp.ne.s32.totalorder %s1545_s18, %s1541_s17  ;;  %p284_p4 = scmp.eq.s32.totalorder %s1377_s22, 1 }
   0xa   : > { %s1662_s26 = scalar_select %p265_p1, %s1549_s19, %s267_s24  }
   0xb   : > { %p1664_p5 = por %p278_p2, %p277_p0  ;;  %p1668_p6 = por %p284_p4, %p283_p3 }
   0xc   : > { %2017 = sst [smem:[#allocation5_spill]] %s1662_s26  ;;  %p1380_p7 = scmp.ge.s32.totalorder %s1553_s20, 1 }
   0xd   : > { %p339_p8 = scmp.lt.s32.totalorder %s1553_s20, 3 }
   0xf   : > { %p340_p9 = pnand %p1380_p7, %p339_p8 }
  0x10   : > { %p378_p10 = scmp.lt.s32.totalorder (!%p340_p9), %s1647_s21, 1  ;;  %s2020_s0 = sld [smem:[#allocation6_spill]] (!%p340_p9) }
  0x11   : > { %343 = sbr.rel (%p340_p9) target bundleno = 1770 (0x6ea), region = 64  ;;  %s1555_s14 = smov (!%p340_p9), 96  }
  0x12   : > { %s1556_s15 = smov (!%p340_p9), 120   ;;  %s1558_s22 = smov (!%p340_p9), 104  }
  0x13   : > { %s1562_s24 = smov (!%p340_p9), 24   ;;  %s1564_s29 = smov (!%p340_p9), 8  }
  0x14   : > { %s1399_s12 = sshll.u32 (!%p340_p9), %s1647_s21, 3 }
  0x16   : > { %v386_v0 = vld [vmem:[%s2005_s1 + $0x18] sm:$0xff]  ;;  %v385_v1 = vld [vmem:[%s2005_s1 + $0x10] sm:$0xff]  ;;  %v384_v2 = vld [vmem:[%s2005_s1 + $0x8] sm:$0xff]  ;;  %s379_s16 = scalar_select %p378_p10, %s1647_s21, 1  ;;  %vm391_vm0 = vcmask 261120   ;;  %vm426_vm1 = vcmask 1047556  }
  0x17   : > { %407 = vmatpush.msra.mxu0 %v386_v0  ;;  %v383_v3 = vld [vmem:[%s2005_s1] sm:$0xff]  ;;  %v1560_v13 = vmov 1983009808   ;;  %v1561_v26 = vmov 1934713408   ;;  %vm780_vm2 = vcmask 64512  }
  0x18   : > { %s1382_s25 = sshll.u32 %s379_s16, 3  ;;  %v1462_v5 = vld [vmem:[%s2006_s2] ss:$0 sm:$0xff]  ;;  %s1557_s16 = smov 112   ;;  %v431_v14 = vunpack.c.l.s4 %v1560_v13  ;;  %v455_v27 = vunpack.c.l.s4 %v1561_v26  ;;  %vm1156_vm3 = vcmask 130048   ;;  %vm1158_vm4 = vcmask 195584  }
  0x19   : > { %408 = vmatpush.msra.mxu0 %v385_v1  ;;  %s381_s26 = scalar_lea.vmem %s2020_s0, %s1382_s25  ;;  %s1563_s25 = smov 16   ;;  %vm1244_vm9 = vcmask 523264  }
  0x1a   : > { %v1691_v4 = vld [vmem:[%s381_s26] sm:$0xff]  ;;  %s1559_s26 = smov 64   ;;  %v1698_v17 = vunpack.c.0.s8 %v431_v14  ;;  %v1708_v32 = vunpack.c.0.s8 %v455_v27 }
  0x1b   : > { %409 = vmatpush.msra.mxu0 %v384_v2 }
  0x1d   : > { %410 = vmatpush.msra.mxu0 %v383_v3 }
  0x1e   : > { %1383 = vmatmul.msk.f32.vlgmr.msra.gmra.mxu0 %vm391_vm0, %v1691_v4 }
  0x9b   : > { %v412_v6 = vpop.f32.mrf.mxu0 }
  0x9c   : > { %v413_v7 = vadd.f32 %v1462_v5, %v412_v6 }
  0x9e   : > { %536 = vrot.lane.b32.xlu2 %v413_v7, %s1555_s14  ;;  %416 = vrot.lane.b32.xlu1 %v413_v7, %s1556_s15  ;;  %v428_v16 = vrot.slane %v413_v7, 4 }
  0x9f   : > { %419 = vrot.lane.b32.xlu0 %v413_v7, %s1557_s16 }
  0xa7   : > { %422 = vrot.lane.b32.xlu0 %v413_v7, %s1558_s22  ;;  %s1313_s22 = scalar_lea.hbm %s2015_s11, %s1399_s12 }
  0xa8   : > { %s1317_s0 = sshll.u32 %s1313_s22, 4  ;;  %s1318_s0 = int_to_ptr.hbm [resolvable:$true] %s1317_s0 }
  0xf8   : > { %v537_v49 = vpop.permute.xlu2 %536 }
  0xf9   : > { %v550_v5 = vrot.slane %v537_v49, 4 }
 0x110   : > { %v417_v8 = vpop.permute.xlu1 %416 }
 0x111   : > { %v420_v9 = vpop.permute.xlu0 %419  ;;  %538 = vrot.lane.b32.xlu0 %v417_v8, %s1555_s14  ;;  %v1452_v10 = vpack.i.bf16 %v417_v8, %v413_v7  ;;  %v440_v19 = vrot.slane %v417_v8, 4 }
 0x112   : > { %540 = vrot.lane.b32.xlu1 %v420_v9, %s1555_s14  ;;  %v425_v15 = vrot.slane %v420_v9, 4  ;;  %v429_v20 = vsel %vm426_vm1, %v420_v9, %v428_v16 }
 0x113   : > { %v437_v23 = vperm.slane %v429_v20, %v1698_v17 }
 0x114   : > { %v427_v21 = vsel %vm426_vm1, %v425_v15, %v413_v7 }
 0x115   : > { %v433_v25 = vperm.slane %v427_v21, %v1698_v17  ;;  %v464_v30 = vrot.slane %v437_v23, 4 }
 0x117   : > { %v452_v31 = vrot.slane %v433_v25, 4 }
 0x119   : > { %v423_v11 = vpop.permute.xlu0 %422 }
 0x11a   : > { %1453 = vrot.lane.b32.xlu1 %v1452_v10, %s1559_s26  ;;  %542 = vrot.lane.b32.xlu2 %v423_v11, %s1555_s14  ;;  %v1457_v12 = vpack.i.bf16 %v423_v11, %v420_v9  ;;  %v438_v18 = vrot.slane %v423_v11, 4  ;;  %v441_v22 = vsel %vm426_vm1, %v423_v11, %v440_v19  ;;  %s1505_s14 = sshra.s32 %s1318_s0, 4  ;;  %s1506_s14 = int_to_ptr.hbm [resolvable:$true] %s1505_s14 }
 0x11b   : > { %v449_v28 = vperm.slane %v441_v22, %v1698_v17  ;;  %s1507_s12 = scalar_lea.hbm %s1506_s14, 8  ;;  %p1512_p0 = scmp.lt.s32.totalorder %s1506_s14, %s2015_s11 }
 0x11c   : > { %v439_v24 = vsel %vm426_vm1, %v438_v18, %v417_v8  ;;  %p1508_p11 = scmp.ne.s32.totalorder %s1506_s14, %s1507_s12 }
 0x11d   : > { %v445_v29 = vperm.slane %v439_v24, %v1698_v17  ;;  %v462_v33 = vrot.slane %v449_v28, 4  ;;  %v465_v34 = vsel %vm426_vm1, %v449_v28, %v464_v30 }
 0x11e   : > { %v473_v37 = vperm.slane %v465_v34, %v1708_v32  ;;  %p1509_p12 = pnand %p1508_p11, %p1664_p5 }
 0x11f   : > { %v450_v35 = vrot.slane %v445_v29, 4  ;;  %v453_v36 = vsel %vm426_vm1, %v445_v29, %v452_v31  ;;  %v463_v39 = vsel %vm426_vm1, %v462_v33, %v437_v23 }
 0x120   : > { %v461_v38 = vperm.slane %v453_v36, %v1708_v32  ;;  %v469_v41 = vperm.slane %v463_v39, %v1708_v32  ;;  %v480_v42 = vrot.slane %v473_v37, 4  ;;  %p1510_p13 = pneg %p1509_p12 }
 0x121   : > { %v451_v40 = vsel %vm426_vm1, %v450_v35, %v433_v25 }
 0x122   : > { %1458 = vrot.lane.b32.xlu2 %v1457_v12, %s1559_s26  ;;  %v457_v43 = vperm.slane %v451_v40, %v1708_v32  ;;  %v476_v44 = vrot.slane %v461_v38, 4  ;;  %v478_v45 = vrot.slane %v469_v41, 4  ;;  %v481_v46 = vsel %vm426_vm1, 0.0, %v480_v42 }
 0x123   : > { %v498_v50 = vrot.slane %v481_v46, 4  ;;  %v493_v54 = vsel %vm426_vm1, %v480_v42, %v469_v41 }
 0x124   : > { %v474_v47 = vrot.slane %v457_v43, 4  ;;  %v477_v48 = vsel %vm426_vm1, 0.0, %v476_v44  ;;  %v479_v51 = vsel %vm426_vm1, 0.0, %v478_v45  ;;  %v482_v57 = vsel %vm426_vm1, %v476_v44, %v457_v43 }
 0x125   : > { %v487_v52 = vrot.slane %v477_v48, 4  ;;  %v499_v55 = vsel %vm426_vm1, %v498_v50, %v479_v51  ;;  %v497_v59 = vperm.slane %v493_v54, %v1698_v17  ;;  %v486_v62 = vperm.slane %v482_v57, %v1698_v17 }
 0x126   : > { %v475_v53 = vsel %vm426_vm1, 0.0, %v474_v47  ;;  %v503_v60 = vperm.slane %v499_v55, %v1698_v17 }
 0x127   : > { %v488_v56 = vsel %vm426_vm1, %v487_v52, %v475_v53  ;;  %v518_v63 = vrot.slane %v497_v59, 4  ;;  %v506_v3 = vrot.slane %v486_v62, 4 }
 0x128   : > { %v492_v61 = vperm.slane %v488_v56, %v1698_v17  ;;  %v516_v0 = vrot.slane %v503_v60, 4 }
 0x129   : > { %v519_v10 = vsel %vm426_vm1, %v503_v60, %v518_v63 }
 0x12a   : > { %v504_v1 = vrot.slane %v492_v61, 4  ;;  %v517_v11 = vsel %vm426_vm1, %v516_v0, %v497_v59  ;;  %v507_v20 = vsel %vm426_vm1, %v492_v61, %v506_v3  ;;  %v1742_v24 = vperm.slane %v519_v10, %v1708_v32 }
 0x12b   : > { %v1749_v28 = vperm.slane %v517_v11, %v1708_v32  ;;  %v1752_v31 = vperm.slane %v507_v20, %v1708_v32 }
 0x12c   : > { %v505_v15 = vsel %vm426_vm1, %v504_v1, %v486_v62  ;;  %v532_v40 = vrot.slane %v1742_v24, 4 }
 0x12d   : > { %v1746_v27 = vperm.slane %v505_v15, %v1708_v32  ;;  %v528_v44 = vrot.slane %v1749_v28, 4 }
 0x12f   : > { %v530_v45 = vrot.slane %v1746_v27, 4 }
 0x174   : > { %v543_v58 = vpop.permute.xlu2 %542 }
 0x175   : > { %v560_v2 = vrot.slane %v543_v58, 4 }
 0x17c   : > { %v1459_v16 = vpop.permute.xlu2 %1458 }
 0x17d   : > { %v1461_v29 = vunpack.i.h.bf16 %v1459_v16  ;;  %v1460_v33 = vunpack.i.l.bf16 %v1459_v16 }
 0x17f   : > { %v682_v50 = vrot.slane %v1461_v29, 4  ;;  %v670_v51 = vrot.slane %v1460_v33, 4 }
 0x183   : > { %v539_v6 = vpop.permute.xlu0 %538 }
 0x184   : > { %v541_v7 = vpop.permute.xlu1 %540  ;;  %v561_v8 = vsel %vm426_vm1, %v560_v2, %v539_v6  ;;  %v562_v9 = vrot.slane %v539_v6, 4 }
 0x185   : > { %v548_v12 = vrot.slane %v541_v7, 4  ;;  %v551_v13 = vsel %vm426_vm1, %v541_v7, %v550_v5  ;;  %v567_v14 = vperm.slane %v561_v8, %v1698_v17 }
 0x186   : > { %v559_v18 = vperm.slane %v551_v13, %v1698_v17  ;;  %v563_v19 = vsel %vm426_vm1, %v543_v58, %v562_v9 }
 0x187   : > { %v549_v21 = vsel %vm426_vm1, %v548_v12, %v537_v49  ;;  %v571_v22 = vperm.slane %v563_v19, %v1698_v17  ;;  %v572_v23 = vrot.slane %v567_v14, 4 }
 0x188   : > { %v555_v25 = vperm.slane %v549_v21, %v1698_v17  ;;  %v586_v26 = vrot.slane %v559_v18, 4 }
 0x189   : > { %v584_v30 = vrot.slane %v571_v22, 4 }
 0x18a   : > { %v574_v34 = vrot.slane %v555_v25, 4  ;;  %v573_v35 = vsel %vm426_vm1, %v572_v23, %v555_v25  ;;  %v587_v36 = vsel %vm426_vm1, %v571_v22, %v586_v26 }
 0x18b   : > { %v579_v37 = vperm.slane %v573_v35, %v1708_v32  ;;  %v585_v38 = vsel %vm426_vm1, %v584_v30, %v559_v18  ;;  %v595_v39 = vperm.slane %v587_v36, %v1708_v32 }
 0x18c   : > { %v575_v41 = vsel %vm426_vm1, %v567_v14, %v574_v34  ;;  %v591_v42 = vperm.slane %v585_v38, %v1708_v32  ;;  %v1454_v43 = vpop.permute.xlu1 %1453 }
 0x18d   : > { %v583_v46 = vperm.slane %v575_v41, %v1708_v32  ;;  %v596_v47 = vrot.slane %v579_v37, 4  ;;  %v602_v48 = vrot.slane %v595_v39, 4  ;;  %v1456_v49 = vunpack.i.h.bf16 %v1454_v43 }
 0x18e   : > { %v600_v52 = vrot.slane %v591_v42, 4  ;;  %v1455_v53 = vunpack.i.l.bf16 %v1454_v43 }
 0x18f   : > { %v597_v54 = vsel %vm426_vm1, 0.0, %v596_v47  ;;  %v598_v55 = vrot.slane %v583_v46, 4  ;;  %v603_v56 = vsel %vm426_vm1, 0.0, %v602_v48  ;;  %v684_v57 = vrot.slane %v1456_v49, 4 }
 0x190   : > { %v620_v58 = vrot.slane %v603_v56, 4  ;;  %v671_v59 = vsel %vm426_vm1, %v670_v51, %v1455_v53  ;;  %v672_v60 = vrot.slane %v1455_v53, 4  ;;  %v683_v61 = vsel %vm426_vm1, %v682_v50, %v1456_v49 }
 0x191   : > { %v599_v62 = vsel %vm426_vm1, 0.0, %v598_v55  ;;  %v604_v63 = vsel %vm426_vm1, %v598_v55, %v579_v37  ;;  %v677_v0 = vperm.slane %v671_v59, %v1698_v17  ;;  %v685_v1 = vsel %vm426_vm1, %v1461_v29, %v684_v57 }
 0x192   : > { %v609_v2 = vrot.slane %v599_v62, 4  ;;  %v673_v3 = vsel %vm426_vm1, %v1460_v33, %v672_v60  ;;  %v689_v5 = vperm.slane %v683_v61, %v1698_v17  ;;  %v693_v6 = vperm.slane %v685_v1, %v1698_v17 }
 0x193   : > { %v681_v7 = vperm.slane %v673_v3, %v1698_v17  ;;  %v696_v8 = vrot.slane %v677_v0, 4  ;;  %v601_v9 = vsel %vm426_vm1, 0.0, %v600_v52  ;;  %v608_v10 = vperm.slane %v604_v63, %v1698_v17 }
 0x194   : > { %v694_v11 = vrot.slane %v689_v5, 4  ;;  %v706_v12 = vrot.slane %v693_v6, 4  ;;  %v610_v13 = vsel %vm426_vm1, %v609_v2, %v597_v54  ;;  %v615_v14 = vsel %vm426_vm1, %v602_v48, %v591_v42 }
 0x195   : > { %v697_v15 = vsel %vm426_vm1, %v689_v5, %v696_v8  ;;  %v708_v16 = vrot.slane %v681_v7, 4  ;;  %v614_v18 = vperm.slane %v610_v13, %v1698_v17  ;;  %v619_v19 = vperm.slane %v615_v14, %v1698_v17 }
 0x196   : > { %v695_v20 = vsel %vm426_vm1, %v694_v11, %v677_v0  ;;  %v705_v21 = vperm.slane %v697_v15, %v1708_v32  ;;  %v707_v22 = vsel %vm426_vm1, %v706_v12, %v681_v7  ;;  %v621_v23 = vsel %vm426_vm1, %v620_v58, %v601_v9 }
 0x197   : > { %v701_v25 = vperm.slane %v695_v20, %v1708_v32  ;;  %v709_v26 = vsel %vm426_vm1, %v693_v6, %v708_v16  ;;  %v713_v29 = vperm.slane %v707_v22, %v1708_v32  ;;  %v625_v30 = vperm.slane %v621_v23, %v1698_v17 }
 0x198   : > { %v717_v33 = vperm.slane %v709_v26, %v1708_v32  ;;  %v720_v34 = vrot.slane %v705_v21, 4  ;;  %v628_v35 = vrot.slane %v608_v10, 4  ;;  %v640_v36 = vrot.slane %v619_v19, 4 }
 0x199   : > { %v718_v37 = vrot.slane %v701_v25, 4  ;;  %v722_v38 = vrot.slane %v713_v29, 4  ;;  %v626_v39 = vrot.slane %v614_v18, 4  ;;  %v638_v41 = vrot.slane %v625_v30, 4 }
 0x19a   : > { %v721_v42 = vsel %vm426_vm1, 0.0, %v720_v34  ;;  %v724_v43 = vrot.slane %v717_v33, 4  ;;  %v726_v46 = vsel %vm426_vm1, %v720_v34, %v701_v25  ;;  %v629_v47 = vsel %vm426_vm1, %v614_v18, %v628_v35 }
 0x19b   : > { %v719_v48 = vsel %vm426_vm1, 0.0, %v718_v37  ;;  %v731_v49 = vrot.slane %v721_v42, 4  ;;  %v637_v50 = vperm.slane %v629_v47, %v1708_v32  ;;  %v641_v51 = vsel %vm426_vm1, %v625_v30, %v640_v36 }
 0x19c   : > { %v725_v52 = vsel %vm426_vm1, 0.0, %v724_v43  ;;  %v649_v53 = vperm.slane %v641_v51, %v1708_v32  ;;  %v627_v54 = vsel %vm426_vm1, %v626_v39, %v608_v10  ;;  %v639_v55 = vsel %vm426_vm1, %v638_v41, %v619_v19 }
 0x19d   : > { %v742_v56 = vrot.slane %v725_v52, 4  ;;  %v633_v57 = vperm.slane %v627_v54, %v1708_v32  ;;  %v645_v58 = vperm.slane %v639_v55, %v1708_v32  ;;  %v656_v59 = vrot.slane %v637_v50, 4 }
 0x19e   : > { %v654_v60 = vrot.slane %v649_v53, 4  ;;  %v723_v61 = vsel %vm426_vm1, 0.0, %v722_v38  ;;  %v730_v62 = vperm.slane %v726_v46, %v1698_v17  ;;  %v732_v63 = vsel %vm426_vm1, %v731_v49, %v719_v48 }
 0x19f   : > { %v650_v0 = vrot.slane %v645_v58, 4  ;;  %v657_v1 = vsel %vm426_vm1, %v649_v53, %v656_v59  ;;  %v652_v2 = vrot.slane %v633_v57, 4  ;;  %v736_v3 = vperm.slane %v732_v63, %v1698_v17 }
 0x1a0   : > { %v655_v5 = vsel %vm426_vm1, %v654_v60, %v637_v50  ;;  %v737_v6 = vsel %vm426_vm1, %v724_v43, %v713_v29  ;;  %v743_v7 = vsel %vm426_vm1, %v742_v56, %v723_v61  ;;  %v750_v8 = vrot.slane %v730_v62, 4 }
 0x1a1   : > { %1388 = vmatpush.xpose.msk.msrb.mxu0 %vm780_vm2, %v655_v5  ;;  %v651_v9 = vsel %vm426_vm1, %v650_v0, %v633_v57  ;;  %v653_v10 = vsel %vm426_vm1, %v645_v58, %v652_v2  ;;  %v741_v11 = vperm.slane %v737_v6, %v1698_v17  ;;  %v747_v12 = vperm.slane %v743_v7, %v1698_v17 }
 0x1a2   : > { %1384 = vmatpush.xpose.msk.msra.mxu1 %vm780_vm2, %v651_v9  ;;  %1386 = vmatpush.xpose.msk.msra.mxu2 %vm780_vm2, %v653_v10  ;;  %v751_v13 = vsel %vm426_vm1, %v736_v3, %v750_v8  ;;  %v748_v14 = vrot.slane %v736_v3, 4  ;;  %v533_v15 = vsel %vm426_vm1, %v532_v40, %v1752_v31  ;;  %v529_v20 = vsel %vm426_vm1, %v528_v44, %v1746_v27 }
 0x1a3   : > { %v759_v16 = vperm.slane %v751_v13, %v1708_v32  ;;  %v762_v18 = vrot.slane %v741_v11, 4  ;;  %v760_v19 = vrot.slane %v747_v12, 4  ;;  %v531_v21 = vsel %vm426_vm1, %v1749_v28, %v530_v45 }
 0x1a4   : > { %1389 = vmatmul.msk.f32.vlgmr.msrb.gmra.mxu0 %vm780_vm2, %v533_v15  ;;  %v749_v40 = vsel %vm426_vm1, %v748_v14, %v730_v62  ;;  %v534_v30 = vrot.slane %v1752_v31, 4 }
 0x1a5   : > { %1385 = vmatmul.msk.f32.vlgmr.msra.gmra.mxu1 %vm780_vm2, %v529_v20  ;;  %1387 = vmatmul.msk.f32.vlgmr.msra.gmra.mxu2 %vm780_vm2, %v531_v21  ;;  %v763_v22 = vsel %vm426_vm1, %v747_v12, %v762_v18  ;;  %v778_v23 = vrot.slane %v759_v16, 4  ;;  %v755_v25 = vperm.slane %v749_v40, %v1708_v32  ;;  %v761_v26 = vsel %vm426_vm1, %v760_v19, %v741_v11 }
 0x1a6   : > { %1390 = vmatpush.xpose.msk.msrb.mxu1 %vm780_vm2, %v657_v1  ;;  %v771_v44 = vperm.slane %v763_v22, %v1708_v32  ;;  %v767_v27 = vperm.slane %v761_v26, %v1708_v32  ;;  %v535_v37 = vsel %vm426_vm1, %v1742_v24, %v534_v30 }
 0x1a7   : > { %v774_v29 = vrot.slane %v755_v25, 4 }
 0x1a8   : > { %v779_v28 = vsel %vm426_vm1, %v771_v44, %v778_v23  ;;  %v776_v45 = vrot.slane %v771_v44, 4  ;;  %v772_v33 = vrot.slane %v767_v27, 4 }
 0x1a9   : > { %v775_v34 = vsel %vm426_vm1, %v767_v27, %v774_v29 }
 0x1aa   : > { %1024 = vmatpush.msra.mxu1 %v779_v28  ;;  %978 = vmatpush.msra.mxu3 %v775_v34  ;;  %v777_v35 = vsel %vm426_vm1, %v776_v45, %v759_v16  ;;  %v773_v36 = vsel %vm426_vm1, %v772_v33, %v755_v25 }
 0x1ab   : > { %1001 = vmatpush.msra.mxu0 %v777_v35  ;;  %955 = vmatpush.msrb.mxu2 %v773_v36 }
 0x1ad   : > { %1391 = vmatmul.msk.f32.vlgmr.msrb.gmra.mxu1 %vm780_vm2, %v535_v37 }
 0x221   : > { %v856_v38 = vpop.f32.mrf.mxu0 }
 0x222   : > { %v891_v39 = vsel %vm780_vm2, %v856_v38, -inf  ;;  %v804_v31 = vpop.f32.mrf.mxu1 }
 0x223   : > { %892 = vmax.xlane.f32.xlu2 %v891_v39  ;;  %v885_v41 = vsel %vm780_vm2, %v804_v31, -inf }
 0x224   : > { %886 = vmax.xlane.f32.xlu0 %v885_v41 }
 0x228   : > { %v830_v42 = vpop.f32.mrf.mxu2 }
 0x229   : > { %v888_v43 = vsel %vm780_vm2, %v830_v42, -inf }
 0x22a   : > { %v882_v46 = vpop.f32.mrf.mxu1  ;;  %889 = vmax.xlane.f32.xlu1 %v888_v43 }
 0x22b   : > { %v894_v47 = vsel %vm780_vm2, %v882_v46, -inf }
 0x22c   : > { %895 = vmax.xlane.f32.xlu2 %v894_v47 }
 0x296   : > { %v893_v48 = vpop.xlane.xlu2 %892 }
 0x297   : > { %v899_v24 = vsub.f32 %v856_v38, %v893_v48  ;;  %v887_v49 = vpop.xlane.xlu0 %886 }
 0x298   : > { %v897_v50 = vsub.f32 %v804_v31, %v887_v49 }
 0x299   : > { %v905_v51 = vmul.f32 1.442695, %v899_v24 }
 0x29a   : > { %v901_v52 = vmul.f32 1.442695, %v897_v50 }
 0x29b   : > { %1469 = vpow2.f32 %v905_v51 }
 0x29c   : > { %1471 = vpow2.f32 %v901_v52 }
 0x29d   : > { %v890_v53 = vpop.xlane.xlu1 %889 }
 0x29e   : > { %v898_v54 = vsub.f32 %v830_v42, %v890_v53 }
 0x29f   : > { %v896_v55 = vpop.xlane.xlu2 %895 }
 0x2a0   : > { %v903_v56 = vmul.f32 1.442695, %v898_v54  ;;  %v900_v57 = vsub.f32 %v882_v46, %v896_v55 }
 0x2a1   : > { %v1470_v58 = vpop.eup %1469 }
 0x2a2   : > { %v1472_v59 = vpop.eup %1471  ;;  %1473 = vpow2.f32 %v903_v56  ;;  %v907_v60 = vmul.f32 1.442695, %v900_v57  ;;  %1394 = vmatmul.msk.f32.vlgmr.msra.gmra.mxu0 %vm780_vm2, %v1470_v58  ;;  %v915_v61 = vsel %vm780_vm2, %v1470_v58, 0.0 }
 0x2a3   : > { %916 = vadd.xlane.f32.xlu0 %v915_v61  ;;  %1392 = vmatmul.msk.f32.vlgmr.msrb.gmra.mxu2 %vm780_vm2, %v1472_v59  ;;  %v909_v62 = vsel %vm780_vm2, %v1472_v59, 0.0 }
 0x2a4   : > { %1475 = vpow2.f32 %v907_v60  ;;  %910 = vadd.xlane.f32.xlu1 %v909_v62 }
 0x2a8   : > { %v1474_v63 = vpop.eup %1473 }
 0x2a9   : > { %1393 = vmatmul.msk.f32.vlgmr.msra.gmra.mxu3 %vm780_vm2, %v1474_v63  ;;  %v912_v0 = vsel %vm780_vm2, %v1474_v63, 0.0 }
 0x2aa   : > { %v1476_v1 = vpop.eup %1475 }
 0x2ab   : > { %1395 = vmatmul.msk.f32.vlgmr.msra.gmra.mxu1 %vm780_vm2, %v1476_v1  ;;  %913 = vadd.xlane.f32.xlu0 %v912_v0  ;;  %v918_v2 = vsel %vm780_vm2, %v1476_v1, 0.0 }
 0x2ac   : > { %919 = vadd.xlane.f32.xlu2 %v918_v2 }
 0x316   : > { %v917_v3 = vpop.xlane.xlu0 %916 }
 0x317   : > { %1477 = vrcp.f32 %v917_v3  ;;  %v911_v5 = vpop.xlane.xlu1 %910 }
 0x318   : > { %1479 = vrcp.f32 %v911_v5 }
 0x31d   : > { %v1478_v6 = vpop.eup %1477 }
 0x31e   : > { %v1480_v7 = vpop.eup %1479  ;;  %v927_v8 = vmul.f32 %v1478_v6, %v917_v3  ;;  %v914_v9 = vpop.xlane.xlu0 %913 }
 0x31f   : > { %v925_v10 = vmul.f32 %v1480_v7, %v911_v5  ;;  %1481 = vrcp.f32 %v914_v9  ;;  %v920_v11 = vpop.xlane.xlu2 %919  ;;  %v1003_v15 = vpop.f32.mrf.mxu0 }
 0x320   : > { %v931_v12 = vsub.f32 2.0, %v927_v8  ;;  %1483 = vrcp.f32 %v920_v11 }
 0x321   : > { %v929_v13 = vsub.f32 2.0, %v925_v10 }
 0x322   : > { %v935_v14 = vmul.f32 %v1478_v6, %v931_v12 }
 0x323   : > { %v933_v19 = vmul.f32 %v1480_v7, %v929_v13 }
 0x324   : > { %v1031_v18 = vmul.f32 %v1003_v15, %v935_v14 }
 0x325   : > { %v1482_v16 = vpop.eup %1481 }
 0x326   : > { %v1484_v20 = vpop.eup %1483  ;;  %v926_v21 = vmul.f32 %v1482_v16, %v914_v9  ;;  %v957_v40 = vpop.f32.mrf.mxu2  ;;  %v1033_v26 = vrot.slane %v1031_v18, 4 }
 0x327   : > { %v928_v22 = vmul.f32 %v1484_v20, %v920_v11  ;;  %v1029_v23 = vmul.f32 %v957_v40, %v933_v19 }
 0x328   : > { %v930_v25 = vsub.f32 2.0, %v926_v21  ;;  %v1026_v33 = vpop.f32.mrf.mxu1 }
 0x329   : > { %v932_v44 = vsub.f32 2.0, %v928_v22  ;;  %v1035_v27 = vrot.slane %v1029_v23, 4  ;;  %v1034_v29 = vsel %vm426_vm1, %v1033_v26, %v1029_v23 }
 0x32a   : > { %v934_v30 = vmul.f32 %v1482_v16, %v930_v25  ;;  %v1040_v37 = vperm.slane %v1034_v29, %v1698_v17 }
 0x32b   : > { %v1036_v28 = vsel %vm426_vm1, %v1031_v18, %v1035_v27  ;;  %v936_v45 = vmul.f32 %v1484_v20, %v932_v44 }
 0x32c   : > { %v980_v34 = vpop.f32.mrf.mxu3  ;;  %v1044_v38 = vperm.slane %v1036_v28, %v1698_v17  ;;  %v1059_v43 = vrot.slane %v1040_v37, 4 }
 0x32d   : > { %v1032_v35 = vmul.f32 %v1026_v33, %v936_v45  ;;  %v1030_v36 = vmul.f32 %v980_v34, %v934_v30 }
 0x32e   : > { %v1071_v46 = vrot.slane %v1044_v38, 4 }
 0x32f   : > { %v1045_v39 = vrot.slane %v1032_v35, 4  ;;  %v1047_v31 = vrot.slane %v1030_v36, 4 }
 0x331   : > { %v1046_v41 = vsel %vm426_vm1, %v1045_v39, %v1030_v36  ;;  %v1048_v42 = vsel %vm426_vm1, %v1032_v35, %v1047_v31  ;;  %v1565_v31 = vmov 32.0  }
 0x332   : > { %v1052_v47 = vperm.slane %v1046_v41, %v1698_v17  ;;  %v1056_v48 = vperm.slane %v1048_v42, %v1698_v17  ;;  %1485 = vrcp.f32 %v1565_v31 }
 0x334   : > { %v1057_v24 = vrot.slane %v1052_v47, 4  ;;  %v1060_v49 = vsel %vm426_vm1, %v1052_v47, %v1059_v43  ;;  %v1069_v50 = vrot.slane %v1056_v48, 4  ;;  %v1072_v51 = vsel %vm426_vm1, %v1056_v48, %v1071_v46 }
 0x335   : > { %v1068_v52 = vperm.slane %v1060_v49, %v1708_v32  ;;  %v1080_v53 = vperm.slane %v1072_v51, %v1708_v32 }
 0x336   : > { %v1058_v54 = vsel %vm426_vm1, %v1057_v24, %v1040_v37  ;;  %v1070_v55 = vsel %vm426_vm1, %v1069_v50, %v1044_v38 }
 0x337   : > { %v1064_v56 = vperm.slane %v1058_v54, %v1708_v32  ;;  %v1076_v57 = vperm.slane %v1070_v55, %v1708_v32  ;;  %v1083_v58 = vrot.slane %v1068_v52, 4  ;;  %v1087_v59 = vrot.slane %v1080_v53, 4  ;;  %v1203_v52 = vld [vmem:[%s2007_s3 + $0x18] sm:$0xff]  ;;  %v1202_v53 = vld [vmem:[%s2007_s3 + $0x10] sm:$0xff]  ;;  %v1201_v54 = vld [vmem:[%s2007_s3 + $0x8] sm:$0xff] }
 0x338   : > { %v1486_v41 = vpop.eup %1485  ;;  %1223 = vmatpush.msra.mxu2 %v1203_v52  ;;  %v1200_v55 = vld [vmem:[%s2007_s3] sm:$0xff] }
 0x339   : > { %v1081_v60 = vrot.slane %v1064_v56, 4  ;;  %v1084_v61 = vsel %vm426_vm1, 0.0, %v1083_v58  ;;  %v1088_v62 = vsel %vm426_vm1, 0.0, %v1087_v59  ;;  %v1089_v63 = vsel %vm426_vm1, %v1083_v58, %v1064_v56  ;;  %v1239_v56 = vld [vmem:[%s2009_s5 + $0x38] sm:$0xff]  ;;  %v1237_v58 = vld [vmem:[%s2009_s5 + $0x28] sm:$0xff] }
 0x33a   : > { %v1094_v0 = vrot.slane %v1084_v61, 4  ;;  %v1105_v1 = vrot.slane %v1088_v62, 4  ;;  %v1085_v2 = vrot.slane %v1076_v57, 4  ;;  %v1093_v3 = vperm.slane %v1089_v63, %v1698_v17  ;;  %1224 = vmatpush.msra.mxu2 %v1202_v53  ;;  %1256 = vmatpush.msrb.mxu3 %v1239_v56  ;;  %v1236_v61 = vld [vmem:[%s2009_s5 + $0x20] sm:$0xff]  ;;  %v1235_v63 = vld [vmem:[%s2009_s5 + $0x18] sm:$0xff] }
 0x33b   : > { %v1082_v5 = vsel %vm426_vm1, 0.0, %v1081_v60  ;;  %v1100_v6 = vsel %vm426_vm1, %v1087_v59, %v1076_v57  ;;  %v1167_v42 = vmul.f32 32.0, %v1486_v41  ;;  %vm1171_vm5 = vweird.f32 %v1486_v41  ;;  %v1238_v57 = vld [vmem:[%s2009_s5 + $0x30] sm:$0xff] }
 0x33c   : > { %v1086_v7 = vsel %vm426_vm1, 0.0, %v1085_v2  ;;  %v1095_v8 = vsel %vm426_vm1, %v1094_v0, %v1082_v5  ;;  %v1104_v9 = vperm.slane %v1100_v6, %v1698_v17  ;;  %v1113_v10 = vrot.slane %v1093_v3, 4  ;;  %1225 = vmatpush.msra.mxu2 %v1201_v54  ;;  %1257 = vmatpush.msrb.mxu3 %v1238_v57 }
 0x33d   : > { %v1099_v11 = vperm.slane %v1095_v8, %v1698_v17  ;;  %v1106_v12 = vsel %vm426_vm1, %v1105_v1, %v1086_v7  ;;  %v1168_v43 = vsub.f32 1.0, %v1167_v42  ;;  %v1463_v7 = vld [vmem:[%s2011_s7] ss:$0 sm:$0xff] }
 0x33e   : > { %v1110_v13 = vperm.slane %v1106_v12, %v1698_v17  ;;  %v1125_v14 = vrot.slane %v1104_v9, 4  ;;  %1226 = vmatpush.msra.mxu2 %v1200_v55  ;;  %1258 = vmatpush.msrb.mxu3 %v1237_v58 }
 0x33f   : > { %v1114_v15 = vsel %vm426_vm1, %v1099_v11, %v1113_v10  ;;  %v1111_v16 = vrot.slane %v1099_v11, 4  ;;  %v1169_v46 = vmul.f32 %v1486_v41, %v1168_v43  ;;  %v1464_v10 = vld [vmem:[%s2012_s8] ss:$0 sm:$0xff] }
 0x340   : > { %v1122_v18 = vperm.slane %v1114_v15, %v1708_v32  ;;  %v1126_v19 = vsel %vm426_vm1, %v1110_v13, %v1125_v14  ;;  %v1123_v20 = vrot.slane %v1110_v13, 4  ;;  %1259 = vmatpush.msrb.mxu3 %v1236_v61  ;;  %v1234_v13 = vld [vmem:[%s2009_s5 + $0x10] sm:$0xff]  ;;  %v1233_v14 = vld [vmem:[%s2009_s5 + $0x8] sm:$0xff]  ;;  %v1232_v15 = vld [vmem:[%s2009_s5] sm:$0xff] }
 0x341   : > { %v1134_v21 = vperm.slane %v1126_v19, %v1708_v32  ;;  %v1112_v40 = vsel %vm426_vm1, %v1111_v16, %v1093_v3  ;;  %v1170_v47 = vadd.f32 %v1486_v41, %v1169_v46  ;;  %v1465_v16 = vld [vmem:[%s2008_s4] ss:$0 sm:$0xff] }
 0x342   : > { %v1141_v22 = vrot.slane %v1122_v18, 4  ;;  %v1118_v23 = vperm.slane %v1112_v40, %v1708_v32  ;;  %v1124_v25 = vsel %vm426_vm1, %v1123_v20, %v1104_v9  ;;  %1260 = vmatpush.msrb.mxu3 %v1235_v63 }
 0x343   : > { %v1139_v26 = vrot.slane %v1134_v21, 4  ;;  %v1130_v17 = vperm.slane %v1124_v25, %v1708_v32  ;;  %v1907_v48 = vsel %vm1171_vm5, %v1486_v41, %v1170_v47  ;;  %v1468_v41 = vld [vmem:[%s2014_s10] ss:$0 sm:$0xff] }
 0x344   : > { %v1142_v44 = vsel %vm426_vm1, %v1134_v21, %v1141_v22  ;;  %v1137_v27 = vrot.slane %v1118_v23, 4  ;;  %1261 = vmatpush.msrb.mxu3 %v1234_v13  ;;  %v1466_v21 = vld [vmem:[%s2010_s6] ss:$0 sm:$0xff] }
 0x345   : > { %1152 = vrot.lane.b32.xlu0 %v1142_v44, %s1562_s24  ;;  %v1140_v29 = vsel %vm426_vm1, %v1139_v26, %v1122_v18  ;;  %v1135_v28 = vrot.slane %v1130_v17, 4 }
 0x346   : > { %1148 = vrot.lane.b32.xlu2 %v1140_v29, %s1563_s25  ;;  %v1138_v45 = vsel %vm426_vm1, %v1130_v17, %v1137_v27  ;;  %1262 = vmatpush.msrb.mxu3 %v1233_v14 }
 0x347   : > { %1144 = vrot.lane.b32.xlu1 %v1138_v45, %s1564_s29  ;;  %v1136_v30 = vsel %vm426_vm1, %v1135_v28, %v1118_v23  ;;  %s375_s29 = sand.u32 1, %s1545_s18  }
 0x348   : > { %1263 = vmatpush.msrb.mxu3 %v1232_v15  ;;  %s1381_s30 = sshll.u32 %s375_s29, 3  ;;  %s1303_s13 = scalar_lea.sflag [#allocation3], %s375_s29 }
 0x349   : > { %s377_s25 = scalar_lea.vmem [#allocation2], %s1381_s30  ;;  %s1511_s30 = scalar_lea.hbm %s2015_s11, 16 }
 0x34a   : > { %s1315_s21 = sshll.u32 %s377_s25, 4  ;;  %p1513_p1 = scmp.lt.s32.totalorder %s1511_s30, %s1507_s12  ;;  %s1316_s21 = int_to_ptr.vmem [resolvable:$true] %s1315_s21 }
 0x34c   : > { %p1514_p2 = por %p1513_p1, %p1512_p0 }
 0x34e   : > { %p1515_p3 = pnand %p1514_p2, %p1510_p13 }
 0x3a0   : > { %v1149_v32 = vpop.permute.xlu2 %1148 }
 0x3b7   : > { %v1153_v35 = vpop.permute.xlu0 %1152 }
 0x3b9   : > { %v1145_v33 = vpop.permute.xlu1 %1144 }
 0x3ba   : > { %v1155_v34 = vsel %vm780_vm2, %v1136_v30, %v1145_v33 }
 0x3bb   : > { %v1157_v36 = vsel %vm1156_vm3, %v1155_v34, %v1149_v32 }
 0x3bc   : > { %v1159_v37 = vsel %vm1158_vm4, %v1157_v36, %v1153_v35 }
 0x3bd   : > { %v1160_v38 = vadd.f32 %v1159_v37, %v1691_v4 }
 0x3bf   : > { %v1163_v39 = vsel %vm391_vm0, %v1160_v38, 0.0 }
 0x3c0   : > { %1164 = vadd.xlane.f32.xlu1 %v1163_v39 }
 0x433   : > { %v1165_v24 = vpop.xlane.xlu1 %1164 }
 0x434   : > { %v1173_v49 = vmul.f32 %v1907_v48, %v1165_v24 }
 0x436   : > { %v1174_v50 = vsub.f32 %v1160_v38, %v1173_v49  ;;  %v1467_v38 = vld [vmem:[%s2013_s9] ss:$0 sm:$0xff] }
 0x438   : > { %v1175_v51 = vmul.f32 %v1174_v50, %v1174_v50 }
 0x43a   : > { %v1176_v4 = vsel %vm391_vm0, %v1175_v51, 0.0 }
 0x43b   : > { %1177 = vadd.xlane.f32.xlu0 %v1176_v4 }
 0x4ae   : > { %v1178_v59 = vpop.xlane.xlu0 %1177 }
 0x4af   : > { %v1179_v60 = vmul.f32 %v1178_v59, %v1907_v48 }
 0x4b1   : > { %v1180_v62 = vadd.f32 1e-05, %v1179_v60 }
 0x4b3   : > { %1487 = vrsqrt.f32 %v1180_v62  ;;  %vm1187_vm7 = vweird.f32 %v1180_v62 }
 0x4b9   : > { %v1488_v0 = vpop.eup %1487 }
 0x4ba   : > { %v1182_v1 = vmul.f32 %v1488_v0, %v1180_v62  ;;  %vm1188_vm6 = vweird.f32 %v1488_v0 }
 0x4bb   : > { %vm1189_vm8 = vmor %vm1187_vm7, %vm1188_vm6 }
 0x4bc   : > { %v1183_v2 = vmul.f32 %v1488_v0, %v1182_v1 }
 0x4be   : > { %v1184_v3 = vmul.f32 0.5, %v1183_v2 }
 0x4c0   : > { %v1185_v5 = vsub.f32 1.5, %v1184_v3 }
 0x4c2   : > { %v1186_v6 = vmul.f32 %v1488_v0, %v1185_v5 }
 0x4c4   : > { %v1190_v8 = vsel %vm1189_vm8, %v1488_v0, %v1186_v6 }
 0x4c5   : > { %v1191_v9 = vmul.f32 %v1190_v8, %v1174_v50 }
 0x4c7   : > { %v1195_v11 = vmul.f32 %v1463_v7, %v1191_v9 }
 0x4c9   : > { %v1199_v12 = vadd.f32 %v1464_v10, %v1195_v11 }
 0x4cb   : > { %1396 = vmatmul.msk.f32.vlgmr.msra.gmra.mxu2 %vm391_vm0, %v1199_v12 }
 0x54e   : > { %v1228_v18 = vpop.f32.mrf.mxu2 }
 0x54f   : > { %v1229_v19 = vadd.f32 %v1465_v16, %v1228_v18 }
 0x551   : > { %v1231_v20 = vmax.f32 %v1229_v19, 0.0 }
 0x553   : > { %1397 = vmatmul.msk.f32.vlgmr.msrb.gmra.mxu3 %vm1244_vm9, %v1231_v20 }
 0x5d6   : > { %v1265_v40 = vpop.f32.mrf.mxu3 }
 0x5d7   : > { %v1266_v22 = vadd.f32 %v1466_v21, %v1265_v40 }
 0x5d9   : > { %v1268_v23 = vadd.f32 %v1266_v22, %v1199_v12 }
 0x5db   : > { %v1271_v25 = vsel %vm391_vm0, %v1268_v23, 0.0 }
 0x5dc   : > { %1272 = vadd.xlane.f32.xlu2 %v1271_v25 }
 0x64f   : > { %v1273_v26 = vpop.xlane.xlu2 %1272 }
 0x650   : > { %v1274_v17 = vmul.f32 %v1273_v26, %v1907_v48 }
 0x652   : > { %v1275_v44 = vsub.f32 %v1268_v23, %v1274_v17 }
 0x654   : > { %v1276_v27 = vmul.f32 %v1275_v44, %v1275_v44 }
 0x656   : > { %v1277_v29 = vsel %vm391_vm0, %v1276_v27, 0.0 }
 0x657   : > { %1278 = vadd.xlane.f32.xlu1 %v1277_v29 }
 0x6ca   : > { %v1279_v28 = vpop.xlane.xlu1 %1278 }
 0x6cb   : > { %v1280_v45 = vmul.f32 %v1279_v28, %v1907_v48 }
 0x6cd   : > { %v1281_v30 = vadd.f32 1e-05, %v1280_v45 }
 0x6cf   : > { %1489 = vrsqrt.f32 %v1281_v30  ;;  %vm1288_vm11 = vweird.f32 %v1281_v30 }
 0x6d5   : > { %v1490_v33 = vpop.eup %1489 }
 0x6d6   : > { %v1283_v32 = vmul.f32 %v1490_v33, %v1281_v30  ;;  %vm1289_vm10 = vweird.f32 %v1490_v33 }
 0x6d7   : > { %vm1290_vm12 = vmor %vm1288_vm11, %vm1289_vm10 }
 0x6d8   : > { %v1284_v34 = vmul.f32 %v1490_v33, %v1283_v32 }
 0x6da   : > { %v1285_v35 = vmul.f32 0.5, %v1284_v34 }
 0x6dc   : > { %v1286_v36 = vsub.f32 1.5, %v1285_v35 }
 0x6de   : > { %v1287_v37 = vmul.f32 %v1490_v33, %v1286_v36 }
 0x6e0   : > { %v1291_v39 = vsel %vm1290_vm12, %v1490_v33, %v1287_v37 }
 0x6e1   : > { %v1292_v31 = vmul.f32 %v1291_v39, %v1275_v44 }
 0x6e3   : > { %v1296_v42 = vmul.f32 %v1467_v38, %v1292_v31 }
 0x6e5   : > { %v1300_v43 = vadd.f32 %v1468_v41, %v1296_v42 }
 0x6e7   : > { %1301 = vst.msk [vmem:[%s377_s25] sm:$0xff] %vm391_vm0, %v1300_v43 }
 0x6e8   : > { %1518 = shalt.err (!%p1515_p3)
}
 0x6e9   : > { %1402 = dma.vmem_to_hbm [thread:$0]  (%p1664_p5), %s1316_s21, 128, %s1318_s0, %s1303_s13  }
 0x6ea PF: > { %p1408_p4 = scmp.ge.s32.totalorder %s1553_s20, 2  ;;  %s1329_s29 = sand.u32 1, %s1541_s17  }
 0x6eb   : > { %s1330_s24 = scalar_lea.sflag [#allocation3], %s1329_s29 }
 0x6ec   : > { %p1405_p7 = pnand %p1408_p4, %p1668_p6 }
 0x6ee   : > { %p1406_p8 = pneg %p1405_p7 }
 0x6f0   : > { %1536 = dma.done.wait (%p1406_p8), %s1330_s24, 128  }
 0x6f1   : > { %1538 = vsyncadd (%p1406_p8), %s1330_s24, 4294967168  ;;  %s2021_s25 = sld [smem:[#allocation5_spill]]  ;;  %p21_p9 = scmp.ge.s32.totalorder %s1651_s23, 4  }
 0x6f2   : > { %s2022_s17 = smov %s1545_s18  ;;  %s2023_s18 = smov %s1549_s19 }
 0x6f3   : > { %s2025_s20 = smov %s1651_s23  ;;  %23 = sbr.rel (!%p21_p9) target bundleno = 5 (0x5), region = 99 }
 0x6f7   : > { %s2024_s19 = smov %s2021_s25 }
 0x6f8   :  { %1336 = vsyncpa [#allocation3], 1 }
 0x6f9   :  { %1338 = vsyncpa [#allocation3 + $0x1], 1 }

</bundles_post_ra>
